<compile_context>
chip_gen: v7x
topology: tpu7x:2x2x1
jax: 0.10.0
libtpu: 0.0.40
codegen_flags: <defaults>
</compile_context>

<pallas_src>
import functools

import jax
import jax.numpy as jnp
from jax.experimental import pallas as pl
from jax.experimental.pallas import tpu as pltpu


def rmsnorm_kernel(x_ref, w_ref, o_ref, *, eps, dim, x_dtype):
    # Compute in float32 (matches x.float() in PyTorch).
    x = x_ref[...].astype(jnp.float32)                        # (tile_rows, dim)
    ms = jnp.sum(x * x, axis=-1, keepdims=True) * (1.0 / dim)
    inv = jax.lax.rsqrt(ms + eps)                             # EUP slot, cheap

    if jnp.dtype(x_dtype) == jnp.float32 and jnp.dtype(o_ref.dtype) == jnp.float32:
        # Fast path: single multiply chain, one store, no redundant casts.
        o_ref[...] = (x * inv) * w_ref[...].astype(jnp.float32)
    else:
        # PyTorch-exact path: output.type_as(x) then * weight (promoted dtype).
        normed = (x * inv).astype(x_dtype)
        o_ref[...] = normed.astype(o_ref.dtype) * w_ref[...].astype(o_ref.dtype)


def _sublane_for(dtype):
    itemsize = jnp.dtype(dtype).itemsize
    if itemsize >= 4:
        return 8
    if itemsize == 2:
        return 16
    return 32


def _vmem_capacity_bytes():
    try:
        info = pltpu.get_tpu_info()
        cap = getattr(info, "vmem_capacity_bytes", None)
        if cap:
            return int(cap)
    except Exception:
        pass
    return 64 << 20  # conservative default (v7x per-core VMEM)


def _choose_tile_rows(rows, dim_vmem, x_bytes, out_bytes, sublane, vmem_cap):
    # Per-row VMEM footprint: input tile + output tile + f32 upcast temp for
    # sub-32-bit inputs (the compiler materializes it as internal scratch).
    temp_bytes = 4 if x_bytes < 4 else 0
    per_row = dim_vmem * (x_bytes + out_bytes + temp_bytes)

    # Generation-aware target per tile set: big enough to amortize the
    # ~0.35 us/step grid overhead, small enough that double-buffered tiles
    # (plus upcast scratch and weight) stay well inside physical VMEM.
    usable = max(vmem_cap - (16 << 20), 8 << 20)
    target = min(16 << 20, usable // 4)          # ~16 MiB v5e/v6e, ~12 MiB v7x

    t = max(sublane, (target // per_row) // sublane * sublane)
    rows_ceil = pl.cdiv(rows, sublane) * sublane
    t = min(t, rows_ceil)

    # Keep >= 4 grid steps when rows allow (>= 2 per TensorCore on dual-core
    # chips), so each core retains inbound/outbound DMA overlap.
    min_steps = 4
    if rows_ceil >= min_steps * sublane:
        cap_t = max(sublane, (rows_ceil // min_steps) // sublane * sublane)
        t = min(t, cap_t)
    return t


def rmsnorm(x, weight, eps):
    """RMSNorm over the last axis of x; semantics match the PyTorch module."""
    orig_shape = x.shape
    dim = orig_shape[-1]
    rows = 1
    for s in orig_shape[:-1]:
        rows *= s

    out_dtype = jnp.promote_types(x.dtype, weight.dtype)
    x_bytes = jnp.dtype(x.dtype).itemsize
    out_bytes = jnp.dtype(out_dtype).itemsize
    w_bytes = jnp.dtype(weight.dtype).itemsize

    # VMEM lane footprint of one row (lanes pad to 128 inside VMEM only; HBM
    # traffic and block shapes use the true dim).
    dim_vmem = pl.cdiv(dim, 128) * 128

    sublane = max(_sublane_for(x.dtype), _sublane_for(out_dtype))
    vmem_cap = _vmem_capacity_bytes()
    tile_rows = _choose_tile_rows(rows, dim_vmem, x_bytes, out_bytes, sublane, vmem_cap)

    x2 = x.reshape(rows, dim)
    w2 = weight.reshape(1, dim)

    grid = (pl.cdiv(rows, tile_rows),)  # ragged last block is masked by Pallas

    # Explicit VMEM budget: double-buffered x + out tiles, double-buffered
    # weight row, f32 upcast scratch for low-precision inputs, 2 MiB headroom.
    tile_x = tile_rows * dim_vmem * x_bytes
    tile_out = tile_rows * dim_vmem * out_bytes
    upcast = tile_rows * dim_vmem * 4 if x_bytes < 4 else 0
    vmem_limit = 2 * (tile_x + tile_out) + 2 * dim_vmem * w_bytes + upcast + (2 << 20)
    usable = max(vmem_cap - (8 << 20), 16 << 20)
    vmem_limit = int(min(max(vmem_limit, 4 << 20), usable))

    cost = pl.CostEstimate(
        flops=3 * rows * dim,
        transcendentals=rows,
        bytes_accessed=rows * dim * (x_bytes + out_bytes) + dim * w_bytes,
    )

    kernel = functools.partial(rmsnorm_kernel, eps=eps, dim=dim, x_dtype=x.dtype)

    out = pl.pallas_call(
        kernel,
        out_shape=jax.ShapeDtypeStruct((rows, dim), out_dtype),
        grid_spec=pltpu.PrefetchScalarGridSpec(
            num_scalar_prefetch=0,
            grid=grid,
            in_specs=[
                pl.BlockSpec((tile_rows, dim), lambda i: (i, 0)),  # x tile
                pl.BlockSpec((1, dim), lambda i: (0, 0)),          # weight row
            ],
            out_specs=pl.BlockSpec((tile_rows, dim), lambda i: (i, 0)),
        ),
        compiler_params=pltpu.CompilerParams(
            dimension_semantics=("parallel",),
            vmem_limit_bytes=vmem_limit,
        ),
        cost_estimate=cost,
    )(x2, w2)

    return out.reshape(orig_shape[:-1] + (dim,)).astype(out_dtype)


if __name__ == "__main__":
    key = jax.random.PRNGKey(0)
    batch, seq, dim = 2, 8, 32
    eps = 1e-6

    # --- f32 main test (module defaults: weight = ones(dim)) ---
    x = jax.random.normal(key, (batch, seq, dim), dtype=jnp.float32)
    weight = jnp.ones((dim,), dtype=jnp.float32)

    out = jax.block_until_ready(rmsnorm(x, weight, eps))

    xf = x.astype(jnp.float32)
    ref = (xf * jax.lax.rsqrt(jnp.mean(xf * xf, axis=-1, keepdims=True) + eps)
           ).astype(x.dtype) * weight
    assert out.shape == x.shape
    assert out.dtype == jnp.promote_types(x.dtype, weight.dtype)
    assert jnp.allclose(out, ref, atol=1e-5, rtol=1e-5), "mismatch vs reference"

    # --- non-divisible rows (ragged last block, masked stores) ---
    x2 = jax.random.normal(jax.random.PRNGKey(1), (3, 37, 256), dtype=jnp.float32)
    w2 = jax.random.normal(jax.random.PRNGKey(2), (256,), dtype=jnp.float32)
    o2 = jax.block_until_ready(rmsnorm(x2, w2, eps))
    r2 = (x2 * jax.lax.rsqrt(jnp.mean(x2 * x2, axis=-1, keepdims=True) + eps)) * w2
    assert jnp.allclose(o2, r2, atol=1e-5, rtol=1e-5), "mismatch vs reference (ragged case)"

    # --- bf16 input, f32 weight (low-precision / PyTorch type_as path) ---
    x3 = jax.random.normal(jax.random.PRNGKey(3), (batch, seq, dim), dtype=jnp.bfloat16)
    w3 = jax.random.normal(jax.random.PRNGKey(4), (dim,), dtype=jnp.float32)
    o3 = jax.block_until_ready(rmsnorm(x3, w3, eps))
    x3f = x3.astype(jnp.float32)
    n3 = (x3f * jax.lax.rsqrt(jnp.mean(x3f * x3f, axis=-1, keepdims=True) + eps)
          ).astype(x3.dtype)
    r3 = n3.astype(jnp.float32) * w3
    assert o3.dtype == jnp.float32
    assert jnp.allclose(o3, r3, atol=1e-2, rtol=1e-2), "mismatch vs reference (bf16 case)"

    print("KERNEL_OK")
</pallas_src>

<mosaic_0001>
module attributes {stable_mosaic.version = 11 : i64} {
  func.func @rmsnorm_kernel(%arg0: i32, %arg1: memref<16x32xf32, #tpu.memory_space<vmem>>, %arg2: memref<1x32xf32, #tpu.memory_space<vmem>>, %arg3: memref<16x32xf32, #tpu.memory_space<vmem>>) attributes {dimension_semantics = [#tpu.dimension_semantics<parallel>], iteration_bounds = array<i64: 1>, scalar_prefetch = 0 : i64, scratch_operands = 0 : i64, tpu.core_type = #tpu.core_type<tc>, window_params = [{transform_indices = @transform_0, window_bounds = array<i64: 16, 32>}, {pipeline_mode = #tpu.pipeline_mode<synchronous>, transform_indices = @transform_1, window_bounds = array<i64: 1, 32>}, {transform_indices = @transform_2, window_bounds = array<i64: 16, 32>}]} {
    %c0 = arith.constant 0 : index
    %c0_0 = arith.constant 0 : index
    %0 = vector.load %arg1[%c0, %c0_0] : memref<16x32xf32, #tpu.memory_space<vmem>>, vector<16x32xf32>
    %1 = arith.mulf %0, %0 : vector<16x32xf32>
    %cst = arith.constant dense<0.000000e+00> : vector<16xf32>
    %2 = vector.multi_reduction <add>, %1, %cst [1] : vector<16x32xf32> to vector<16xf32>
    %3 = vector.shape_cast %2 : vector<16xf32> to vector<16x1xf32>
    %cst_1 = arith.constant 3.125000e-02 : f32
    %4 = vector.broadcast %cst_1 : f32 to vector<16x1xf32>
    %5 = arith.mulf %3, %4 : vector<16x1xf32>
    %cst_2 = arith.constant 9.99999997E-7 : f32
    %6 = vector.broadcast %cst_2 : f32 to vector<16x1xf32>
    %7 = arith.addf %5, %6 : vector<16x1xf32>
    %8 = math.rsqrt %7 : vector<16x1xf32>
    %9 = vector.broadcast %8 : vector<16x1xf32> to vector<16x32xf32>
    %10 = arith.mulf %0, %9 : vector<16x32xf32>
    %c0_3 = arith.constant 0 : index
    %c0_4 = arith.constant 0 : index
    %11 = vector.load %arg2[%c0_3, %c0_4] : memref<1x32xf32, #tpu.memory_space<vmem>>, vector<1x32xf32>
    %12 = vector.broadcast %11 : vector<1x32xf32> to vector<16x32xf32>
    %13 = arith.mulf %10, %12 : vector<16x32xf32>
    %c0_5 = arith.constant 0 : index
    %c0_6 = arith.constant 0 : index
    %14 = vector.load %arg3[%c0_5, %c0_6] : memref<16x32xf32, #tpu.memory_space<vmem>>, vector<16x32xf32>
    tpu.vector_store %arg3[%c0_5, %c0_6], %13 {strides = array<i32>} : memref<16x32xf32, #tpu.memory_space<vmem>>, vector<16x32xf32>,
    return
  }
  func.func @transform_0(%arg0: i32) -> (i32, i32) {
    %c0_i32 = arith.constant 0 : i32
    %c0_i32_0 = arith.constant 0 : i32
    return %arg0, %c0_i32 : i32, i32
  }
  func.func @transform_1(%arg0: i32) -> (i32, i32) {
    %c0_i32 = arith.constant 0 : i32
    %c0_i32_0 = arith.constant 0 : i32
    %c0_i32_1 = arith.constant 0 : i32
    return %c0_i32, %c0_i32_0 : i32, i32
  }
  func.func @transform_2(%arg0: i32) -> (i32, i32) {
    %c0_i32 = arith.constant 0 : i32
    %c0_i32_0 = arith.constant 0 : i32
    return %arg0, %c0_i32 : i32, i32
  }
}

</mosaic_0001>

<bundles_post_ra>
// kernel: tpu_custom_call.1
= control target key start
LH: loop header
LB: loop body
LE: loop exit
PB: predicated region body
PF: predicated region fallthrough
CT: control target
= control target key end

     0   :  { %7 = vsyncpa [#allocation3], 0  ;;  %s186_s0 = inlined_call_operand.hbm [shape: f32[16,32], index: 0, kind: input, shape index: {}]   ;;  %s187_s1 = inlined_call_operand.vmem [shape: f32[1,32], index: 1, kind: input, shape index: {}]   ;;  %s188_s2 = inlined_call_operand.hbm [shape: f32[16,32], index: 2, kind: output, shape index: {}]  }
   0x1   :  { %8 = vsyncpa [#allocation4], 0  ;;  %s130_s9 = smov [#allocation2]   ;;  %s82_s13 = scalar_lea.hbm %s186_s0, 256 }
   0x2   :  { %s14_s10 = sshll.u32 %s130_s9, 4  ;;  %p83_p0 = scmp.ne.s32.totalorder %s186_s0, %s82_s13  ;;  %s15_s10 = int_to_ptr.vmem [resolvable:$true] %s14_s10 }
   0x3   :  { %p86_p1 = scmp.lt.u32.totalorder %s82_s13, %s186_s0 }
   0x5   :  { %p88_p2 = pnand %p86_p1, %p83_p0 }
   0x7   :  { %91 = shalt.err (!%p88_p2)
}
   0x8   :  { %s92_s18 = scalar_lea.vmem %s15_s10, 256  ;;  %p97_p4 = scmp.lt.s32.totalorder %s15_s10, %s15_s10 }
   0x9   :  { %p93_p3 = scmp.ne.s32.totalorder %s15_s10, %s92_s18  ;;  %p98_p5 = scmp.lt.s32.totalorder %s92_s18, %s92_s18 }
   0xb   :  { %p99_p6 = por %p98_p5, %p97_p4 }
   0xd   :  { %p100_p7 = pnand %p99_p6, %p93_p3 }
   0xf   :  { %103 = shalt.err (!%p100_p7)
}
  0x10   :  { %s131_s19 = smov 128   ;;  %s132_s20 = smov 8  }
  0x11   :  { %20 = dma.hbm_to_vmem [thread:$0]  %s186_s0, 256, %s15_s10, [#allocation3], %s131_s19, %s131_s19, %s132_s20  }
  0x12   :  { %126 = dma.done.wait [#allocation3], 256  }
  0x13   :  { %127 = vsyncadd [#allocation3], 4294967040  ;;  %v26_v0 = vld [vmem:[#allocation2] sm:$0xff]  ;;  %vm30_vm0 = vcmask 261120   ;;  %v27_v1 = vld [vmem:[#allocation2 + $0x8] sm:$0xff]  ;;  %s133_s24 = smov [#allocation5]  }
  0x14   :  { %v28_v2 = vmul.f32 %v26_v0, %v26_v0  ;;  %v29_v3 = vmul.f32 %v27_v1, %v27_v1  ;;  %v73_v13 = vld [vmem:[%s187_s1] ss:$0 sm:$0xff]  ;;  %s61_s25 = sshll.u32 %s133_s24, 4  ;;  %s62_s25 = int_to_ptr.vmem [resolvable:$true] %s61_s25 }
  0x15   :  { %s104_s26 = scalar_lea.vmem %s62_s25, 256  ;;  %p109_p9 = scmp.lt.s32.totalorder %s62_s25, %s62_s25 }
  0x16   :  { %v31_v4 = vsel %vm30_vm0, %v28_v2, 0.0  ;;  %v34_v5 = vsel %vm30_vm0, %v29_v3, 0.0  ;;  %p105_p8 = scmp.ne.s32.totalorder %s62_s25, %s104_s26  ;;  %p110_p10 = scmp.lt.s32.totalorder %s104_s26, %s104_s26 }
  0x17   :  { %32 = vadd.xlane.f32.xlu0 %v31_v4 }
  0x18   :  { %p111_p11 = por %p110_p10, %p109_p9 }
  0x1a   :  { %p112_p12 = pnand %p111_p11, %p105_p8 }
  0x1b   :  { %35 = vadd.xlane.f32.xlu0 %v34_v5 }
  0xa4   :  { %v33_v6 = vpop.xlane.xlu0 %32 }
  0xa5   :  { %v37_v7 = vmul.f32 0.03125, %v33_v6 }
  0xa7   :  { %v39_v8 = vadd.f32 1e-06, %v37_v7 }
  0xa8   :  { %v36_v9 = vpop.xlane.xlu0 %35 }
  0xa9   :  { %78 = vrsqrt.f32 %v39_v8  ;;  %v38_v10 = vmul.f32 0.03125, %v36_v9 }
  0xab   :  { %v40_v11 = vadd.f32 1e-06, %v38_v10 }
  0xad   :  { %80 = vrsqrt.f32 %v40_v11 }
  0xb3   :  { %v79_v12 = vpop.eup %78 }
  0xb4   :  { %v43_v14 = vmul.f32 %v79_v12, %v26_v0 }
  0xb6   :  { %v52_v15 = vmul.f32 %v73_v13, %v43_v14 }
  0xb7   :  { %v81_v16 = vpop.eup %80 }
  0xb8   :  { %v44_v17 = vmul.f32 %v81_v16, %v27_v1  ;;  %54 = vst.msk [vmem:[#allocation5] sm:$0xff] %vm30_vm0, %v52_v15 }
  0xba   :  { %v53_v18 = vmul.f32 %v73_v13, %v44_v17 }
  0xbc   :  { %55 = vst.msk [vmem:[#allocation5 + $0x8] sm:$0xff] %vm30_vm0, %v53_v18 }
  0xbd   :  { %115 = shalt.err (!%p112_p12)
}
  0xbe   :  { %s116_s28 = scalar_lea.hbm %s188_s2, 256 }
  0xbf   :  { %p117_p13 = scmp.ne.s32.totalorder %s188_s2, %s116_s28  ;;  %p120_p0 = scmp.lt.u32.totalorder %s116_s28, %s188_s2 }
  0xc1   :  { %p122_p1 = pnand %p120_p0, %p117_p13 }
  0xc3   :  { %125 = shalt.err (!%p122_p1)
}
  0xc4   :  { %67 = dma.vmem_to_hbm [thread:$0]  %s62_s25, 256, %s188_s2, [#allocation4], %s131_s19, %s131_s19, %s132_s20  }
  0xc5   :  { %128 = dma.done.wait [#allocation4], 256  }
  0xc6   :  { %129 = vsyncadd [#allocation4], 4294967040 }
  0xc7   :  { %71 = vsyncpa [#allocation3], 1 }
  0xc8   :  { %72 = vsyncpa [#allocation4], 1 }

</bundles_post_ra>
